<compile_context>
chip_gen: v7x
topology: tpu7x:2x2x1
jax: 0.10.0
libtpu: 0.0.40
codegen_flags: <defaults>
</compile_context>

<pallas_src>
import functools

import jax
import jax.numpy as jnp
from jax.experimental import pallas as pl
from jax.experimental.pallas import tpu as pltpu


def _shift_down(v, s):
    # result[t] = v[t - s], zero fill at the top (only frame-edge rows, unused).
    if s == 0:
        return v
    z = jnp.zeros((s, v.shape[1]), v.dtype)
    return jnp.concatenate([z, v[:-s]], axis=0)


def _shift_up(v, s):
    # result[t] = v[t + s], zero fill at the bottom.
    if s == 0:
        return v
    z = jnp.zeros((s, v.shape[1]), v.dtype)
    return jnp.concatenate([v[s:], z], axis=0)


def _cond_dblock_kernel(xm_ref, xl_ref, xr_ref, cm_ref, cl_ref, cr_ref,
                        w1_ref, b1_ref, w2_ref, b2_ref, wr_ref, br_ref,
                        o_ref, *, d, Tt, Hp, Td):
    f32 = jnp.float32
    bf16 = jnp.bfloat16
    F = Tt + 2 * Hp                     # pooled-row frame: halo + interior + halo
    Cin = xm_ref.shape[-1] // d

    def pool(ref):
        # ref block is [1, rows, d*Cin]; AvgPool1d(d) = mean of d lane slices (f32).
        v = ref[0].astype(f32)
        acc = v[:, 0:Cin]
        for j in range(1, d):
            acc = acc + v[:, j * Cin:(j + 1) * Cin]
        return acc * (1.0 / d)

    pooled = jnp.concatenate([pool(xl_ref), pool(xm_ref), pool(xr_ref)], axis=0)   # [F, Cin] f32
    cond = jnp.concatenate([cl_ref[0], cm_ref[0], cr_ref[0]], axis=0)              # [F, Clc] bf16

    # Global pooled-row index of each frame row.  Halo rows outside [0, Td) hold
    # clamped (wrong) data at the sequence boundaries; masking them to zero makes
    # them behave exactly like the convs' zero padding.
    t = pl.program_id(0)
    row = jax.lax.broadcasted_iota(jnp.int32, (F, 1), 0)
    g = t * Tt - Hp + row
    valid = (g >= 0) & (g < Td)

    zero = jnp.zeros((), f32)
    h = jnp.where(valid, jnp.maximum(pooled, 0.0), zero).astype(bf16)

    # start conv (k=3, pad=1) + lc 1x1 conv as a single im2col matmul.
    a1 = jnp.concatenate([_shift_down(h, 1), h, _shift_up(h, 1), cond], axis=-1)
    y = jnp.dot(a1, w1_ref[...], preferred_element_type=f32) + b1_ref[...]

    h2 = jnp.where(valid, jnp.maximum(y, 0.0), zero).astype(bf16)
    # end conv (k=3, dilation=2, pad=2) as a single im2col matmul.
    a2 = jnp.concatenate([_shift_down(h2, 2), h2, _shift_up(h2, 2)], axis=-1)
    y2 = jnp.dot(a2, w2_ref[...], preferred_element_type=f32) + b2_ref[...]

    # residual: Conv1x1 -> AvgPool == Conv1x1(AvgPool)  (exact); interior rows only.
    pooled_in = pooled[Hp:Hp + Tt].astype(bf16)
    resid = jnp.dot(pooled_in, wr_ref[...], preferred_element_type=f32) + br_ref[...]

    o_ref[0] = (y2[Hp:Hp + Tt] + resid).astype(o_ref.dtype)


def cond_dblock(x_ncl, cond_ncl, params, downsample_factor, *,
                time_tile=None, out_dtype=jnp.float32):
    """x_ncl: [B, Cin, T] (PyTorch NCL), cond_ncl: [B, Clc, T//d].
    Returns [B, 2*Cin, T//d] (PyTorch NCL)."""
    B, Cin, T = x_ncl.shape
    Bc, Clc, Td = cond_ncl.shape
    d = downsample_factor
    assert Bc == B and T % d == 0 and Td == T // d
    Cout = params["w_start"].shape[-1]

    Hp = 8  # halo in pooled rows (>= 3 needed; 8 keeps every block sublane-aligned)
    assert Td % Hp == 0, "pooled length T//d must be a multiple of 8 (pad T)"
    if time_tile is None:
        time_tile = Td
        cand = min(Td, 512) // Hp * Hp
        while cand >= Hp:
            if Td % cand == 0:
                time_tile = cand
                break
            cand -= Hp
    Tt = time_tile
    assert Tt % Hp == 0 and Td % Tt == 0, "time_tile must be a multiple of 8 dividing T//d"
    nt = Td // Tt
    Rt = Tt // Hp          # halo-block stride per time tile
    NB = Td // Hp          # number of halo-sized blocks along pooled time

    # NCL -> NLC (channels on lanes), bf16 MXU operands.  For a chain of DBlocks
    # keep activations in NLC bf16 between blocks and drop these transposes.
    x_g = jnp.transpose(x_ncl, (0, 2, 1)).astype(jnp.bfloat16)        # [B, T, Cin]
    x_g = x_g.reshape(B, Td, d * Cin)                                 # free reshape
    c_g = jnp.transpose(cond_ncl, (0, 2, 1)).astype(jnp.bfloat16)     # [B, Td, Clc]

    # im2col-fused weights (big-K RHS fills the 256-deep MXU); biases folded.
    w1 = jnp.concatenate([params["w_start"].reshape(3 * Cin, Cout),
                          params["w_lc"]], axis=0).astype(jnp.bfloat16)
    b1 = (params["b_start"] + params["b_lc"]).astype(jnp.float32)
    w2 = params["w_end"].reshape(3 * Cout, Cout).astype(jnp.bfloat16)
    b2 = params["b_end"].astype(jnp.float32)
    wr = params["w_res"].astype(jnp.bfloat16)
    br = params["b_res"].astype(jnp.float32)

    kern = functools.partial(_cond_dblock_kernel, d=d, Tt=Tt, Hp=Hp, Td=Td)

    def main_map(t, b):
        return (b, t, 0)

    def left_map(t, b):
        return (b, jnp.maximum(t * Rt - 1, 0), 0)

    def right_map(t, b):
        return (b, jnp.minimum(t * Rt + Rt, NB - 1), 0)

    const2 = lambda t, b: (0, 0)

    in_specs = [
        pl.BlockSpec((1, Tt, d * Cin), main_map),     # x interior tile
        pl.BlockSpec((1, Hp, d * Cin), left_map),     # x left halo (clamped)
        pl.BlockSpec((1, Hp, d * Cin), right_map),    # x right halo (clamped)
        pl.BlockSpec((1, Tt, Clc), main_map),         # cond interior tile
        pl.BlockSpec((1, Hp, Clc), left_map),         # cond left halo
        pl.BlockSpec((1, Hp, Clc), right_map),        # cond right halo
        pl.BlockSpec((3 * Cin + Clc, Cout), const2),  # w1 (VMEM-resident)
        pl.BlockSpec((1, Cout), const2),              # b1
        pl.BlockSpec((3 * Cout, Cout), const2),       # w2
        pl.BlockSpec((1, Cout), const2),              # b2
        pl.BlockSpec((Cin, Cout), const2),            # w_res
        pl.BlockSpec((1, Cout), const2),              # b_res
    ]

    flops = 2 * B * Td * ((3 * Cin + Clc) * Cout + 3 * Cout * Cout + Cin * Cout)
    bytes_accessed = (x_g.size * 2 + c_g.size * 2
                      + B * Td * Cout * jnp.dtype(out_dtype).itemsize
                      + (w1.size + w2.size + wr.size) * 2
                      + (b1.size + b2.size + br.size) * 4)

    out_nlc = pl.pallas_call(
        kern,
        out_shape=jax.ShapeDtypeStruct((B, Td, Cout), out_dtype),
        grid=(nt, B),
        in_specs=in_specs,
        out_specs=pl.BlockSpec((1, Tt, Cout), main_map),
        compiler_params=pltpu.CompilerParams(
            dimension_semantics=("parallel", "parallel"),
            # 48 MiB is safe on v7x's 64 MiB VMEM; raise toward ~100 MiB and grow
            # time_tile on v5e/v6e (128 MiB physical).
            vmem_limit_bytes=48 * 1024 * 1024),
        cost_estimate=pl.CostEstimate(flops=int(flops), transcendentals=0,
                                      bytes_accessed=int(bytes_accessed)),
    )(x_g, x_g, x_g, c_g, c_g, c_g, w1, b1, w2, b2, wr, br)

    return jnp.transpose(out_nlc, (0, 2, 1))   # back to PyTorch NCL


def torch_ref(x_ncl, c_ncl, p, d):
    """Plain-JAX f32 reference reproducing the PyTorch forward (NCL layout)."""
    def conv1d(v, w_kio, b_1o, dilation):
        w = jnp.transpose(w_kio, (2, 1, 0))  # [K, Cin, Cout] -> [Cout, Cin, K]
        K = w.shape[-1]
        pad = dilation * (K - 1) // 2
        y = jax.lax.conv_general_dilated(
            v, w, window_strides=(1,), padding=[(pad, pad)],
            rhs_dilation=(dilation,),
            dimension_numbers=("NCH", "OIH", "NCH"),
            precision=jax.lax.Precision.HIGHEST)
        return y + b_1o[0][None, :, None]

    def avgpool(v):
        B, C, L = v.shape
        return v.reshape(B, C, L // d, d).mean(-1)

    start = conv1d(jax.nn.relu(avgpool(x_ncl)), p["w_start"], p["b_start"], 1)
    lc = conv1d(c_ncl, p["w_lc"][None], p["b_lc"], 1)
    out = start + lc
    out = conv1d(jax.nn.relu(out), p["w_end"], p["b_end"], 2)
    res = avgpool(conv1d(x_ncl, p["w_res"][None], p["b_res"], 1))
    return out + res


if __name__ == "__main__":
    B, Cin, Clc, T, d = 2, 4, 8, 32, 2
    Cout = 2 * Cin
    Td = T // d

    keys = jax.random.split(jax.random.PRNGKey(0), 10)
    x = jax.random.normal(keys[0], (B, Cin, T), jnp.float32)
    cond = jax.random.normal(keys[1], (B, Clc, Td), jnp.float32)

    params = {
        "w_start": 0.1 * jax.random.normal(keys[2], (3, Cin, Cout), jnp.float32),
        "b_start": 0.01 * jax.random.normal(keys[3], (1, Cout), jnp.float32),
        "w_lc":    0.1 * jax.random.normal(keys[4], (Clc, Cout), jnp.float32),
        "b_lc":    0.01 * jax.random.normal(keys[5], (1, Cout), jnp.float32),
        "w_end":   0.1 * jax.random.normal(keys[6], (3, Cout, Cout), jnp.float32),
        "b_end":   0.01 * jax.random.normal(keys[7], (1, Cout), jnp.float32),
        "w_res":   0.1 * jax.random.normal(keys[8], (Cin, Cout), jnp.float32),
        "b_res":   0.01 * jax.random.normal(keys[9], (1, Cout), jnp.float32),
    }

    # time_tile=8 -> 2 time tiles: exercises the halo / clamp / mask path.
    out = jax.block_until_ready(cond_dblock(x, cond, params, d, time_tile=8))
    ref = jax.block_until_ready(torch_ref(x, cond, params, d))

    assert out.shape == (B, Cout, Td), out.shape
    max_err = float(jnp.max(jnp.abs(out - ref)))
    # bf16 MXU operands vs. an f32 HIGHEST-precision reference: allow 2e-2.
    assert max_err < 2e-2, f"mismatch vs reference, max abs err = {max_err}"
    print("KERNEL_OK")
</pallas_src>

<mosaic_0001>
module attributes {stable_mosaic.version = 11 : i64} {
  func.func @_cond_dblock_kernel(%arg0: i32, %arg1: i32, %arg2: memref<1x8x8xbf16, #tpu.memory_space<vmem>>, %arg3: memref<1x8x8xbf16, #tpu.memory_space<vmem>>, %arg4: memref<1x8x8xbf16, #tpu.memory_space<vmem>>, %arg5: memref<1x8x8xbf16, #tpu.memory_space<vmem>>, %arg6: memref<1x8x8xbf16, #tpu.memory_space<vmem>>, %arg7: memref<1x8x8xbf16, #tpu.memory_space<vmem>>, %arg8: memref<20x8xbf16, #tpu.memory_space<vmem>>, %arg9: memref<1x8xf32, #tpu.memory_space<vmem>>, %arg10: memref<24x8xbf16, #tpu.memory_space<vmem>>, %arg11: memref<1x8xf32, #tpu.memory_space<vmem>>, %arg12: memref<4x8xbf16, #tpu.memory_space<vmem>>, %arg13: memref<1x8xf32, #tpu.memory_space<vmem>>, %arg14: memref<1x8x8xf32, #tpu.memory_space<vmem>>) attributes {dimension_semantics = [#tpu.dimension_semantics<parallel>, #tpu.dimension_semantics<parallel>], iteration_bounds = array<i64: 2, 2>, scalar_prefetch = 0 : i64, scratch_operands = 0 : i64, tpu.core_type = #tpu.core_type<tc>, window_params = [{transform_indices = @transform_0, window_bounds = array<i64: 1, 8, 8>}, {transform_indices = @transform_1, window_bounds = array<i64: 1, 8, 8>}, {transform_indices = @transform_2, window_bounds = array<i64: 1, 8, 8>}, {transform_indices = @transform_3, window_bounds = array<i64: 1, 8, 8>}, {transform_indices = @transform_4, window_bounds = array<i64: 1, 8, 8>}, {transform_indices = @transform_5, window_bounds = array<i64: 1, 8, 8>}, {pipeline_mode = #tpu.pipeline_mode<synchronous>, transform_indices = @transform_6, window_bounds = array<i64: 20, 8>}, {pipeline_mode = #tpu.pipeline_mode<synchronous>, transform_indices = @transform_7, window_bounds = array<i64: 1, 8>}, {pipeline_mode = #tpu.pipeline_mode<synchronous>, transform_indices = @transform_8, window_bounds = array<i64: 24, 8>}, {pipeline_mode = #tpu.pipeline_mode<synchronous>, transform_indices = @transform_9, window_bounds = array<i64: 1, 8>}, {pipeline_mode = #tpu.pipeline_mode<synchronous>, transform_indices = @transform_10, window_bounds = array<i64: 4, 8>}, {pipeline_mode = #tpu.pipeline_mode<synchronous>, transform_indices = @transform_11, window_bounds = array<i64: 1, 8>}, {transform_indices = @transform_12, window_bounds = array<i64: 1, 8, 8>}]} {
    %c0 = arith.constant 0 : index
    %c0_0 = arith.constant 0 : index
    %c0_1 = arith.constant 0 : index
    %0 = vector.load %arg3[%c0, %c0_0, %c0_1] : memref<1x8x8xbf16, #tpu.memory_space<vmem>>, vector<1x8x8xbf16>
    %1 = vector.shape_cast %0 : vector<1x8x8xbf16> to vector<8x8xbf16>
    %2 = arith.extf %1 : vector<8x8xbf16> to vector<8x8xf32>
    %3 = vector.extract_strided_slice %2 {offsets = [0, 0], sizes = [8, 4], strides = [1, 1]} : vector<8x8xf32> to vector<8x4xf32>
    %4 = vector.extract_strided_slice %2 {offsets = [0, 4], sizes = [8, 4], strides = [1, 1]} : vector<8x8xf32> to vector<8x4xf32>
    %5 = arith.addf %3, %4 : vector<8x4xf32>
    %cst = arith.constant 5.000000e-01 : f32
    %6 = vector.broadcast %cst : f32 to vector<8x4xf32>
    %7 = arith.mulf %5, %6 : vector<8x4xf32>
    %c0_2 = arith.constant 0 : index
    %c0_3 = arith.constant 0 : index
    %c0_4 = arith.constant 0 : index
    %8 = vector.load %arg2[%c0_2, %c0_3, %c0_4] : memref<1x8x8xbf16, #tpu.memory_space<vmem>>, vector<1x8x8xbf16>
    %9 = vector.shape_cast %8 : vector<1x8x8xbf16> to vector<8x8xbf16>
    %10 = arith.extf %9 : vector<8x8xbf16> to vector<8x8xf32>
    %11 = vector.extract_strided_slice %10 {offsets = [0, 0], sizes = [8, 4], strides = [1, 1]} : vector<8x8xf32> to vector<8x4xf32>
    %12 = vector.extract_strided_slice %10 {offsets = [0, 4], sizes = [8, 4], strides = [1, 1]} : vector<8x8xf32> to vector<8x4xf32>
    %13 = arith.addf %11, %12 : vector<8x4xf32>
    %cst_5 = arith.constant 5.000000e-01 : f32
    %14 = vector.broadcast %cst_5 : f32 to vector<8x4xf32>
    %15 = arith.mulf %13, %14 : vector<8x4xf32>
    %c0_6 = arith.constant 0 : index
    %c0_7 = arith.constant 0 : index
    %c0_8 = arith.constant 0 : index
    %16 = vector.load %arg4[%c0_6, %c0_7, %c0_8] : memref<1x8x8xbf16, #tpu.memory_space<vmem>>, vector<1x8x8xbf16>
    %17 = vector.shape_cast %16 : vector<1x8x8xbf16> to vector<8x8xbf16>
    %18 = arith.extf %17 : vector<8x8xbf16> to vector<8x8xf32>
    %19 = vector.extract_strided_slice %18 {offsets = [0, 0], sizes = [8, 4], strides = [1, 1]} : vector<8x8xf32> to vector<8x4xf32>
    %20 = vector.extract_strided_slice %18 {offsets = [0, 4], sizes = [8, 4], strides = [1, 1]} : vector<8x8xf32> to vector<8x4xf32>
    %21 = arith.addf %19, %20 : vector<8x4xf32>
    %cst_9 = arith.constant 5.000000e-01 : f32
    %22 = vector.broadcast %cst_9 : f32 to vector<8x4xf32>
    %23 = arith.mulf %21, %22 : vector<8x4xf32>
    %24 = tpu.concatenate %7, %15, %23 in 0 : vector<8x4xf32>, vector<8x4xf32>, vector<8x4xf32> -> vector<24x4xf32>
    %c0_10 = arith.constant 0 : index
    %c0_11 = arith.constant 0 : index
    %c0_12 = arith.constant 0 : index
    %25 = vector.load %arg6[%c0_10, %c0_11, %c0_12] : memref<1x8x8xbf16, #tpu.memory_space<vmem>>, vector<1x8x8xbf16>
    %26 = vector.shape_cast %25 : vector<1x8x8xbf16> to vector<8x8xbf16>
    %c0_13 = arith.constant 0 : index
    %c0_14 = arith.constant 0 : index
    %c0_15 = arith.constant 0 : index
    %27 = vector.load %arg5[%c0_13, %c0_14, %c0_15] : memref<1x8x8xbf16, #tpu.memory_space<vmem>>, vector<1x8x8xbf16>
    %28 = vector.shape_cast %27 : vector<1x8x8xbf16> to vector<8x8xbf16>
    %c0_16 = arith.constant 0 : index
    %c0_17 = arith.constant 0 : index
    %c0_18 = arith.constant 0 : index
    %29 = vector.load %arg7[%c0_16, %c0_17, %c0_18] : memref<1x8x8xbf16, #tpu.memory_space<vmem>>, vector<1x8x8xbf16>
    %30 = vector.shape_cast %29 : vector<1x8x8xbf16> to vector<8x8xbf16>
    %31 = tpu.concatenate %26, %28, %30 in 0 : vector<8x8xbf16>, vector<8x8xbf16>, vector<8x8xbf16> -> vector<24x8xbf16>
    %32 = tpu.iota {dimensions = array<i32: 0>} : vector<24x1xi32>
    %c8_i32 = arith.constant 8 : i32
    %33 = arith.muli %arg0, %c8_i32 : i32
    %c8_i32_19 = arith.constant 8 : i32
    %34 = arith.subi %33, %c8_i32_19 : i32
    %35 = vector.broadcast %34 : i32 to vector<24x1xi32>
    %36 = arith.addi %35, %32 : vector<24x1xi32>
    %c0_i32 = arith.constant 0 : i32
    %37 = vector.broadcast %c0_i32 : i32 to vector<24x1xi32>
    %38 = arith.cmpi sge, %36, %37 : vector<24x1xi32>
    %c16_i32 = arith.constant 16 : i32
    %39 = vector.broadcast %c16_i32 : i32 to vector<24x1xi32>
    %40 = arith.cmpi slt, %36, %39 : vector<24x1xi32>
    %41 = arith.andi %38, %40 : vector<24x1xi1>
    %cst_20 = arith.constant 0.000000e+00 : f32
    %42 = vector.broadcast %cst_20 : f32 to vector<24x4xf32>
    %43 = arith.maximumf %24, %42 : vector<24x4xf32>
    %cst_21 = arith.constant 0.000000e+00 : f32
    %44 = vector.shape_cast %41 : vector<24x1xi1> to vector<24x1xi1>
    %45 = vector.broadcast %44 : vector<24x1xi1> to vector<24x4xi1>
    %46 = vector.broadcast %cst_21 : f32 to vector<24x4xf32>
    %47 = arith.select %45, %43, %46 : vector<24x4xi1>, vector<24x4xf32>
    %48 = arith.truncf %47 : vector<24x4xf32> to vector<24x4xbf16>
    %cst_22 = arith.constant 0.000000e+00 : bf16
    %49 = vector.broadcast %cst_22 : bf16 to vector<1x4xbf16>
    %50 = vector.extract_strided_slice %48 {offsets = [0, 0], sizes = [23, 4], strides = [1, 1]} : vector<24x4xbf16> to vector<23x4xbf16>
    %51 = tpu.concatenate %49, %50 in 0 : vector<1x4xbf16>, vector<23x4xbf16> -> vector<24x4xbf16>
    %cst_23 = arith.constant 0.000000e+00 : bf16
    %52 = vector.broadcast %cst_23 : bf16 to vector<1x4xbf16>
    %53 = vector.extract_strided_slice %48 {offsets = [1, 0], sizes = [23, 4], strides = [1, 1]} : vector<24x4xbf16> to vector<23x4xbf16>
    %54 = tpu.concatenate %53, %52 in 0 : vector<23x4xbf16>, vector<1x4xbf16> -> vector<24x4xbf16>
    %55 = tpu.concatenate %51, %48, %54, %31 in 1 : vector<24x4xbf16>, vector<24x4xbf16>, vector<24x4xbf16>, vector<24x8xbf16> -> vector<24x20xbf16>
    %c0_24 = arith.constant 0 : index
    %c0_25 = arith.constant 0 : index
    %56 = vector.load %arg8[%c0_24, %c0_25] : memref<20x8xbf16, #tpu.memory_space<vmem>>, vector<20x8xbf16>
    %cst_26 = arith.constant dense<0.000000e+00> : vector<24x8xf32>
    %57 = tpu.matmul %55, %56, %cst_26 {dimension_numbers = #tpu.dot_dimension_numbers<[1], [0], [0], [1], [0, 0, 1, 1], [], []>} : vector<24x20xbf16>, vector<20x8xbf16>, vector<24x8xf32> -> vector<24x8xf32>
    %c0_27 = arith.constant 0 : index
    %c0_28 = arith.constant 0 : index
    %58 = vector.load %arg9[%c0_27, %c0_28] : memref<1x8xf32, #tpu.memory_space<vmem>>, vector<1x8xf32>
    %59 = vector.broadcast %58 : vector<1x8xf32> to vector<24x8xf32>
    %60 = arith.addf %57, %59 : vector<24x8xf32>
    %cst_29 = arith.constant 0.000000e+00 : f32
    %61 = vector.broadcast %cst_29 : f32 to vector<24x8xf32>
    %62 = arith.maximumf %60, %61 : vector<24x8xf32>
    %cst_30 = arith.constant 0.000000e+00 : f32
    %63 = vector.shape_cast %41 : vector<24x1xi1> to vector<24x1xi1>
    %64 = vector.broadcast %63 : vector<24x1xi1> to vector<24x8xi1>
    %65 = vector.broadcast %cst_30 : f32 to vector<24x8xf32>
    %66 = arith.select %64, %62, %65 : vector<24x8xi1>, vector<24x8xf32>
    %67 = arith.truncf %66 : vector<24x8xf32> to vector<24x8xbf16>
    %cst_31 = arith.constant 0.000000e+00 : bf16
    %68 = vector.broadcast %cst_31 : bf16 to vector<2x8xbf16>
    %69 = vector.extract_strided_slice %67 {offsets = [0, 0], sizes = [22, 8], strides = [1, 1]} : vector<24x8xbf16> to vector<22x8xbf16>
    %70 = tpu.concatenate %68, %69 in 0 : vector<2x8xbf16>, vector<22x8xbf16> -> vector<24x8xbf16>
    %cst_32 = arith.constant 0.000000e+00 : bf16
    %71 = vector.broadcast %cst_32 : bf16 to vector<2x8xbf16>
    %72 = vector.extract_strided_slice %67 {offsets = [2, 0], sizes = [22, 8], strides = [1, 1]} : vector<24x8xbf16> to vector<22x8xbf16>
    %73 = tpu.concatenate %72, %71 in 0 : vector<22x8xbf16>, vector<2x8xbf16> -> vector<24x8xbf16>
    %74 = tpu.concatenate %70, %67, %73 in 1 : vector<24x8xbf16>, vector<24x8xbf16>, vector<24x8xbf16> -> vector<24x24xbf16>
    %c0_33 = arith.constant 0 : index
    %c0_34 = arith.constant 0 : index
    %75 = vector.load %arg10[%c0_33, %c0_34] : memref<24x8xbf16, #tpu.memory_space<vmem>>, vector<24x8xbf16>
    %cst_35 = arith.constant dense<0.000000e+00> : vector<24x8xf32>
    %76 = tpu.matmul %74, %75, %cst_35 {dimension_numbers = #tpu.dot_dimension_numbers<[1], [0], [0], [1], [0, 0, 1, 1], [], []>} : vector<24x24xbf16>, vector<24x8xbf16>, vector<24x8xf32> -> vector<24x8xf32>
    %c0_36 = arith.constant 0 : index
    %c0_37 = arith.constant 0 : index
    %77 = vector.load %arg11[%c0_36, %c0_37] : memref<1x8xf32, #tpu.memory_space<vmem>>, vector<1x8xf32>
    %78 = vector.broadcast %77 : vector<1x8xf32> to vector<24x8xf32>
    %79 = arith.addf %76, %78 : vector<24x8xf32>
    %80 = vector.extract_strided_slice %24 {offsets = [8, 0], sizes = [8, 4], strides = [1, 1]} : vector<24x4xf32> to vector<8x4xf32>
    %81 = arith.truncf %80 : vector<8x4xf32> to vector<8x4xbf16>
    %c0_38 = arith.constant 0 : index
    %c0_39 = arith.constant 0 : index
    %82 = vector.load %arg12[%c0_38, %c0_39] : memref<4x8xbf16, #tpu.memory_space<vmem>>, vector<4x8xbf16>
    %cst_40 = arith.constant dense<0.000000e+00> : vector<8x8xf32>
    %83 = tpu.matmul %81, %82, %cst_40 {dimension_numbers = #tpu.dot_dimension_numbers<[1], [0], [0], [1], [0, 0, 1, 1], [], []>} : vector<8x4xbf16>, vector<4x8xbf16>, vector<8x8xf32> -> vector<8x8xf32>
    %c0_41 = arith.constant 0 : index
    %c0_42 = arith.constant 0 : index
    %84 = vector.load %arg13[%c0_41, %c0_42] : memref<1x8xf32, #tpu.memory_space<vmem>>, vector<1x8xf32>
    %85 = vector.broadcast %84 : vector<1x8xf32> to vector<8x8xf32>
    %86 = arith.addf %83, %85 : vector<8x8xf32>
    %87 = vector.extract_strided_slice %79 {offsets = [8, 0], sizes = [8, 8], strides = [1, 1]} : vector<24x8xf32> to vector<8x8xf32>
    %88 = arith.addf %87, %86 : vector<8x8xf32>
    %c0_43 = arith.constant 0 : index
    %c0_44 = arith.constant 0 : index
    %c0_45 = arith.constant 0 : index
    %89 = vector.load %arg14[%c0_43, %c0_44, %c0_45] : memref<1x8x8xf32, #tpu.memory_space<vmem>>, vector<1x8x8xf32>
    %90 = vector.shape_cast %89 : vector<1x8x8xf32> to vector<8x8xf32>
    %91 = vector.shape_cast %88 : vector<8x8xf32> to vector<1x8x8xf32>
    tpu.vector_store %arg14[%c0_43, %c0_44, %c0_45], %91 {strides = array<i32>} : memref<1x8x8xf32, #tpu.memory_space<vmem>>, vector<1x8x8xf32>,
    return
  }
  func.func @transform_0(%arg0: i32, %arg1: i32) -> (i32, i32, i32) {
    %c0_i32 = arith.constant 0 : i32
    %c0_i32_0 = arith.constant 0 : i32
    return %arg1, %arg0, %c0_i32 : i32, i32, i32
  }
  func.func @transform_1(%arg0: i32, %arg1: i32) -> (i32, i32, i32) {
    %c1_i32 = arith.constant 1 : i32
    %0 = arith.muli %arg0, %c1_i32 : i32
    %c1_i32_0 = arith.constant 1 : i32
    %1 = arith.subi %0, %c1_i32_0 : i32
    %c0_i32 = arith.constant 0 : i32
    %2 = arith.maxsi %1, %c0_i32 : i32
    %c0_i32_1 = arith.constant 0 : i32
    %c0_i32_2 = arith.constant 0 : i32
    return %arg1, %2, %c0_i32_1 : i32, i32, i32
  }
  func.func @transform_2(%arg0: i32, %arg1: i32) -> (i32, i32, i32) {
    %c1_i32 = arith.constant 1 : i32
    %0 = arith.muli %arg0, %c1_i32 : i32
    %c1_i32_0 = arith.constant 1 : i32
    %1 = arith.addi %0, %c1_i32_0 : i32
    %c1_i32_1 = arith.constant 1 : i32
    %2 = arith.minsi %1, %c1_i32_1 : i32
    %c0_i32 = arith.constant 0 : i32
    %c0_i32_2 = arith.constant 0 : i32
    return %arg1, %2, %c0_i32 : i32, i32, i32
  }
  func.func @transform_3(%arg0: i32, %arg1: i32) -> (i32, i32, i32) {
    %c0_i32 = arith.constant 0 : i32
    %c0_i32_0 = arith.constant 0 : i32
    return %arg1, %arg0, %c0_i32 : i32, i32, i32
  }
  func.func @transform_4(%arg0: i32, %arg1: i32) -> (i32, i32, i32) {
    %c1_i32 = arith.constant 1 : i32
    %0 = arith.muli %arg0, %c1_i32 : i32
    %c1_i32_0 = arith.constant 1 : i32
    %1 = arith.subi %0, %c1_i32_0 : i32
    %c0_i32 = arith.constant 0 : i32
    %2 = arith.maxsi %1, %c0_i32 : i32
    %c0_i32_1 = arith.constant 0 : i32
    %c0_i32_2 = arith.constant 0 : i32
    return %arg1, %2, %c0_i32_1 : i32, i32, i32
  }
  func.func @transform_5(%arg0: i32, %arg1: i32) -> (i32, i32, i32) {
    %c1_i32 = arith.constant 1 : i32
    %0 = arith.muli %arg0, %c1_i32 : i32
    %c1_i32_0 = arith.constant 1 : i32
    %1 = arith.addi %0, %c1_i32_0 : i32
    %c1_i32_1 = arith.constant 1 : i32
    %2 = arith.minsi %1, %c1_i32_1 : i32
    %c0_i32 = arith.constant 0 : i32
    %c0_i32_2 = arith.constant 0 : i32
    return %arg1, %2, %c0_i32 : i32, i32, i32
  }
  func.func @transform_6(%arg0: i32, %arg1: i32) -> (i32, i32) {
    %c0_i32 = arith.constant 0 : i32
    %c0_i32_0 = arith.constant 0 : i32
    %c0_i32_1 = arith.constant 0 : i32
    return %c0_i32, %c0_i32_0 : i32, i32
  }
  func.func @transform_7(%arg0: i32, %arg1: i32) -> (i32, i32) {
    %c0_i32 = arith.constant 0 : i32
    %c0_i32_0 = arith.constant 0 : i32
    %c0_i32_1 = arith.constant 0 : i32
    return %c0_i32, %c0_i32_0 : i32, i32
  }
  func.func @transform_8(%arg0: i32, %arg1: i32) -> (i32, i32) {
    %c0_i32 = arith.constant 0 : i32
    %c0_i32_0 = arith.constant 0 : i32
    %c0_i32_1 = arith.constant 0 : i32
    return %c0_i32, %c0_i32_0 : i32, i32
  }
  func.func @transform_9(%arg0: i32, %arg1: i32) -> (i32, i32) {
    %c0_i32 = arith.constant 0 : i32
    %c0_i32_0 = arith.constant 0 : i32
    %c0_i32_1 = arith.constant 0 : i32
    return %c0_i32, %c0_i32_0 : i32, i32
  }
  func.func @transform_10(%arg0: i32, %arg1: i32) -> (i32, i32) {
    %c0_i32 = arith.constant 0 : i32
    %c0_i32_0 = arith.constant 0 : i32
    %c0_i32_1 = arith.constant 0 : i32
    return %c0_i32, %c0_i32_0 : i32, i32
  }
  func.func @transform_11(%arg0: i32, %arg1: i32) -> (i32, i32) {
    %c0_i32 = arith.constant 0 : i32
    %c0_i32_0 = arith.constant 0 : i32
    %c0_i32_1 = arith.constant 0 : i32
    return %c0_i32, %c0_i32_0 : i32, i32
  }
  func.func @transform_12(%arg0: i32, %arg1: i32) -> (i32, i32, i32) {
    %c0_i32 = arith.constant 0 : i32
    %c0_i32_0 = arith.constant 0 : i32
    return %arg1, %arg0, %c0_i32 : i32, i32, i32
  }
}

</mosaic_0001>

<bundles_post_ra>
// kernel: tpu_custom_call.1
= control target key start
LH: loop header
LB: loop body
LE: loop exit
PB: predicated region body
PF: predicated region fallthrough
CT: control target
= control target key end

     0   :  { %s1509_s21 = smov 0   ;;  %s1511_s22 = smov 0   ;;  %s1671_s0 = inlined_call_operand.vmem [shape: bf16[2,16,8], index: 0, kind: input, shape index: {}]   ;;  %s1672_s1 = inlined_call_operand.vmem [shape: bf16[2,16,8], index: 1, kind: input, shape index: {}]   ;;  %s1673_s2 = inlined_call_operand.vmem [shape: bf16[2,16,8], index: 2, kind: input, shape index: {}]   ;;  %s1674_s3 = inlined_call_operand.vmem [shape: bf16[2,16,8], index: 3, kind: input, shape index: {}]   ;;  %s1675_s4 = inlined_call_operand.vmem [shape: bf16[2,16,8], index: 4, kind: input, shape index: {}]   ;;  %s1676_s5 = inlined_call_operand.vmem [shape: bf16[2,16,8], index: 5, kind: input, shape index: {}]   ;;  %s1677_s6 = inlined_call_operand.vmem [shape: bf16[20,8], index: 6, kind: input, shape index: {}]   ;;  %s1678_s7 = inlined_call_operand.vmem [shape: f32[1,8], index: 7, kind: input, shape index: {}]   ;;  %s1679_s8 = inlined_call_operand.vmem [shape: bf16[24,8], index: 8, kind: input, shape index: {}]   ;;  %s1680_s9 = inlined_call_operand.vmem [shape: f32[1,8], index: 9, kind: input, shape index: {}]   ;;  %s1681_s10 = inlined_call_operand.vmem [shape: bf16[4,8], index: 10, kind: input, shape index: {}]   ;;  %s1682_s11 = inlined_call_operand.vmem [shape: f32[1,8], index: 11, kind: input, shape index: {}]   ;;  %s1683_s12 = inlined_call_operand.vmem [shape: f32[2,16,8], index: 12, kind: output, shape index: {}]  }
   0x1   :  { %s1513_s23 = smov 0   ;;  %s1515_s24 = smov 0  }
   0x2   :  { %s1517_s25 = smov 0  }
   0x3 LB: > { %1686 = sst [smem:[#allocation2_spill]] %s1427_s23  ;;  %s31_s26 = sadd.s32 1, %s1427_s23  ;;  %s1435_s25 = sphi %s1517_s25, %s22_s25   ;;  %s1431_s24 = sphi %s1515_s24, %s1699_s24   ;;  %s1427_s23 = sphi %s1513_s23, %s1698_s23   ;;  %s1423_s22 = sphi %s1511_s22, %s1697_s22   ;;  %s1419_s21 = sphi %s1509_s21, %s1696_s21  }
   0x4   : > { %1687 = sst [smem:[#allocation3_spill]] %s1431_s24  ;;  %s34_s27 = sadd.s32 1, %s1431_s24 }
   0x5   : > { %p32_p0 = scmp.ge.s32.totalorder %s31_s26, 2  ;;  %p1250_p1 = scmp.ge.s32.totalorder %s1435_s25, 1 }
   0x6   : > { %p504_p2 = scmp.lt.s32.totalorder %s1435_s25, 5 }
   0x7   : > { %s1701_s26 = smov (%p32_p0, %s31_s26), 0  ;;  %s1703_s27 = smov (!%p32_p0, %s34_s27), %s1431_s24 }
   0x8   : > { %1688 = sst [smem:[#allocation4_spill]] %s1701_s26  ;;  %p505_p3 = pnand %p1250_p1, %p504_p2 }
   0x9   : > { %p36_p4 = scmp.ge.s32.totalorder %s1703_s27, 2  ;;  %p604_p5 = scmp.lt.s32.totalorder (!%p505_p3), %s1419_s21, 1  ;;  %vm715_vm0 = vcmask (!%p505_p3), 1043456   ;;  %v719_v10 = vlaneseq (!%p505_p3)  ;;  %v1391_v21 = vld [vmem:[%s1677_s6] sm:$0xff] (!%p505_p3)   ;;  %vm841_vm10 = vcmask (!%p505_p3), 1041408   ;;  %v1439_v46 = vmov (!%p505_p3), 0.0  }
   0xa   : > { %508 = sbr.rel (%p505_p3) target bundleno = 847 (0x34f), region = 68  ;;  %p606_p6 = scmp.lt.s32.totalorder (!%p505_p3), %s1423_s22, 1  ;;  %1314 = vmatprep.subr.bf16.mxu0 (!%p505_p3), %v1391_v21  ;;  %v1392_v31 = vld [vmem:[%s1677_s6 + $0x8] ss:$0 sps:$4 sm:$0x33] (!%p505_p3)   ;;  %vm769_vm15 = vcmask (!%p505_p3), 1040384  }
   0xb   : > { %s1705_s27 = smov (%p36_p4, %s1703_s27), 0  ;;  %s1253_s28 = sadd.s32 (!%p505_p3), 4294967295, %s1423_s22  ;;  %v720_v11 = vshrl.u32 (!%p505_p3), %v719_v10, 7  ;;  %1315 = vmatpush3.bf16.msra.mxu0 (!%p505_p3), %v1391_v21  ;;  %v843_v37 = vsel (!%p505_p3), %vm841_vm10, %v1392_v31, 0  ;;  %vm780_vm11 = vsmask.f32 (!%p505_p3), 3328 }
   0xc   : > { %1689 = sst [smem:[#allocation5_spill]] %s1705_s27  ;;  %p613_p7 = scmp.gt.s32.totalorder (!%p505_p3), %s1253_s28, 0  ;;  %1336 = vmatprep.subr.msk.bf16.mxu0 (!%p505_p3), %vm841_vm10, %v1392_v31  ;;  %vm772_vm12 = vsmask.f32 (!%p505_p3), 7424  ;;  %vm781_vm13 = vmand (!%p505_p3), %vm715_vm0, %vm780_vm11  ;;  %vm752_vm14 = vsmask.f32 (!%p505_p3), 256 }
   0xd   : > { %p1254_p8 = scmp.lt.s32.totalorder (!%p505_p3), %s1253_s28, 1  ;;  %s626_s27 = sadd.s32 (!%p505_p3), 1, %s1423_s22  ;;  %v721_v13 = vadd.s32 (!%p505_p3), 8, %v720_v11  ;;  %v722_v14 = vadd.s32 (!%p505_p3), 16, %v720_v11  ;;  %v1010_v63 = vld [vmem:[%s1681_s10] sm:$0x3] (!%p505_p3) }
   0xe   : > { %p627_p9 = scmp.lt.s32.totalorder (!%p505_p3), %s626_s27, 1  ;;  %v1286_v10 = vld [vmem:[%s1678_s7] ss:$0 sm:$0xff] (!%p505_p3) }
   0xf   : > { %1317 = vmatpush3.bf16.msra.mxu0 (!%p505_p3), %v843_v37 }
  0x10   : > { %1330 = vmatprep.subr.bf16.mxu0 (!%p505_p3), %v1439_v46 }
  0x11   : > { %s1707_s21 = smov (!%p604_p5, %s1419_s21), 1  ;;  %s1709_s28 = smov (!%p613_p7, %s1253_s28), 0 }
  0x12   : > { %s607_s29 = scalar_select %p606_p6, %s1423_s22, 1 }
  0x13   : > { %s1251_s30 = sshll.u32 %s1707_s21, 1  ;;  %s1711_s28 = smov (!%p1254_p8, %s1709_s28), 1 }
  0x14   : > { %s1544_s13 = sadd.s32 %s1251_s30, %s607_s29  ;;  %s620_s21 = sadd.s32 %s1711_s28, %s1251_s30 }
  0x15   : > { %s1252_s14 = sshll.u32 %s1544_s13, 2  ;;  %s1260_s26 = sshll.u32 %s620_s21, 2 }
  0x16   : > { %s611_s17 = scalar_lea.vmem %s1671_s0, %s1252_s14  ;;  %s647_s20 = scalar_lea.vmem %s1674_s3, %s1252_s14 }
  0x17   : > { %v693_v0 = vld [vmem:[%s611_s17] sm:$0xf]  ;;  %s622_s23 = scalar_lea.vmem %s1672_s1, %s1260_s26  ;;  %s1713_s27 = smov (!%p627_p9, %s626_s27), 1 }
  0x18   : > { %v694_v1 = vunpack.c.l.bf16 %v693_v0  ;;  %v685_v2 = vld [vmem:[%s622_s23] sm:$0xf]  ;;  %s1715_s27 = smov (!%p627_p9, %s1713_s27), 1  ;;  %s1437_s14 = smov 124  }
  0x19   : > { %v686_v3 = vunpack.c.l.bf16 %v685_v2  ;;  %s1557_s15 = sadd.s32 %s1251_s30, %s1715_s27  ;;  %s658_s19 = scalar_lea.vmem %s1675_s4, %s1260_s26  ;;  %v1390_v7 = vld [vmem:[%s647_s20] ss:$0 sps:$4 sm:$0xff]  }
  0x1a   : > { %s1265_s16 = sshll.u32 %s1557_s15, 2  ;;  %v709_v8 = vld [vmem:[%s658_s19] sm:$0xf]  ;;  %s1284_s27 = sshll.u32 %s1423_s22, 3 }
  0x1b   : > { %v1385_v4 = vpack.i.bf16 %v694_v1, %v686_v3  ;;  %s636_s24 = scalar_lea.vmem %s1673_s2, %s1265_s16  ;;  %v1569_v9 = vsel %vm715_vm0, %v709_v8, %v1390_v7  ;;  %s1285_s30 = sadd.s32 4294967288, %s1284_s27 }
  0x1c   : > { %v701_v5 = vld [vmem:[%s636_s24] sm:$0xf]  ;;  %v725_v12 = vstv %s1285_s30  ;;  %s1438_s29 = smov 4   ;;  %s672_s24 = scalar_lea.vmem %s1676_s5, %s1265_s16 }
  0x1d   : > { %1386 = vrot.lane.b32.xlu0 %v1385_v4, %s1437_s14  ;;  %v702_v6 = vunpack.c.l.bf16 %v701_v5  ;;  %v726_v15 = vadd.s32 %v725_v12, %v720_v11  ;;  %v727_v16 = vadd.s32 %v725_v12, %v721_v13  ;;  %v728_v18 = vadd.s32 %v725_v12, %v722_v14  ;;  %v711_v56 = vld [vmem:[%s672_s24] sm:$0xf]  ;;  %s1441_s23 = smov 12   ;;  %v1394_v11 = vld [vmem:[%s1679_s8 + $0x8] ss:$0 sps:$4 sm:$0xff]   ;;  %s1443_s22 = smov 16  }
  0x1e   : > { %v961_v13 = vsel %vm715_vm0, %v1394_v11, 0  ;;  %s1282_s17 = sshll.u32 %s1544_s13, 3 }
  0x1f   : > { %vm729_vm1 = vcmp.ge.s32.totalorder %v726_v15, 0  ;;  %vm732_vm2 = vcmp.lt.s32.totalorder %v726_v15, 16  ;;  %vm730_vm3 = vcmp.ge.s32.totalorder %v727_v16, 0  ;;  %vm733_vm4 = vcmp.lt.s32.totalorder %v727_v16, 16  ;;  %s683_s15 = scalar_lea.vmem %s1683_s12, %s1282_s17 }
  0x20   : > { %vm1577_vm5 = vmand %vm729_vm1, %vm732_vm2  ;;  %vm731_vm6 = vcmp.ge.s32.totalorder %v728_v18, 0  ;;  %vm734_vm7 = vcmp.lt.s32.totalorder %v728_v18, 16  ;;  %vm800_vm2 = vcmask 31744  }
  0x21   : > { %704 = vrot.lane.b32.xlu0 %v702_v6, %s1437_s14  ;;  %vm1581_vm8 = vmand %vm730_vm3, %vm733_vm4  ;;  %s1440_s14 = smov 8   ;;  %vm807_vm3 = vcmask 64512   ;;  %vm812_vm4 = vcmask 97280  }
  0x22   : > { %vm1589_vm9 = vmand %vm731_vm6, %vm734_vm7  ;;  %vm836_vm6 = vcmask 162816   ;;  %vm1442_vm7 = vmmov 0  }
  0x23   : > { %vm770_vm1 = vmand %vm769_vm15, %vm752_vm14 }
  0x8f   : > { %v1387_v17 = vpop.permute.xlu0 %1386 }
  0x90   : > { %v1395_v19 = vadd.high.f32.bf16 %v694_v1, %v1387_v17  ;;  %v1396_v20 = vadd.low.f32.bf16 %v686_v3, %v1387_v17 }
  0x92   : > { %v1575_v22 = vmul.f32 0.5, %v1395_v19  ;;  %v692_v23 = vmul.f32 0.5, %v1396_v20 }
  0x93   : > { %v705_v24 = vpop.permute.xlu0 %704 }
  0x94   : > { %v707_v26 = vadd.f32 %v705_v24, %v702_v6  ;;  %v739_v28 = vmax.f32 %v1575_v22, 0.0  ;;  %v738_v29 = vmax.f32 %v692_v23, 0.0  ;;  %v1022_v6 = vsel %vm841_vm10, %v1010_v63, 0 }
  0x95   : > { %v1009_v8 = vpack.c.bf16 %v1575_v22, %v1575_v22  ;;  %vm914_vm10 = vcmask 1042432  }
  0x96   : > { %v708_v30 = vmul.f32 0.5, %v707_v26  ;;  %v747_v33 = vsel %vm1577_vm5, %v738_v29, 0.0  ;;  %v748_v34 = vsel %vm1581_vm8, %v739_v28, 0.0 }
  0x97   : > { %v750_v36 = vpack.c.bf16 %v748_v34, %v747_v33 }
  0x98   : > { %v740_v35 = vmax.f32 %v708_v30, 0.0 }
  0x99   : > { %785 = vrot.lane.b32.xlu1 %v750_v36, %s1438_s29  ;;  %v757_v39 = vshll.u32 %v750_v36, 16  ;;  %v754_v40 = vshrl.u32 %v750_v36, 16 }
  0x9a   : > { %v749_v38 = vsel %vm1589_vm9, %v740_v35, 0.0 }
  0x9b   : > { %v751_v41 = vpack.c.bf16 %v749_v38, %v749_v38  ;;  %v773_v42 = vrot.slane %v757_v39, 1  ;;  %v756_v43 = vrot.slane %v754_v40, 7 }
  0x9d   : > { %v764_v44 = vshll.u32 %v751_v41, 16  ;;  %v761_v45 = vshrl.u32 %v751_v41, 16  ;;  %787 = vrot.lane.b32.xlu1 %v751_v41, %s1438_s29  ;;  %v774_v47 = vor.u32 %v773_v42, %v754_v40  ;;  %v759_v48 = vor.u32 %v757_v39, %v756_v43 }
  0x9f   : > { %v775_v49 = vrot.slane %v764_v44, 1  ;;  %v763_v50 = vrot.slane %v761_v45, 7  ;;  %v771_v60 = vsel %vm770_vm1, 0, %v759_v48 }
  0xa1   : > { %v776_v51 = vsel %vm772_vm12, %v774_v47, %v775_v49  ;;  %v777_v52 = vor.u32 %v775_v49, %v761_v45  ;;  %v766_v53 = vor.u32 %v764_v44, %v763_v50  ;;  %v1296_v49 = vld [vmem:[%s1682_s11] ss:$0 sm:$0xff] }
  0xa2   : > { %790 = vrot.lane.b32.xlu0 %v776_v51, %s1440_s14  ;;  %v1291_v51 = vld [vmem:[%s1680_s9] ss:$0 sm:$0xff] }
  0xa3   : > { %v782_v54 = vsel %vm781_vm13, %v777_v52, 0  ;;  %v767_v55 = vsel %vm752_vm14, %v756_v43, %v766_v53 }
  0xa4   : > { %792 = vrot.lane.b32.xlu1 %v782_v54, %s1440_s14 }
  0xa6   : > { %796 = vrot.lane.b32.xlu0 %v1569_v9, %s1441_s23  ;;  %v1393_v9 = vld [vmem:[%s1679_s8] sm:$0xff]  }
  0xa7   : > { %1322 = vmatprep.subr.bf16.mxu1 %v1393_v9 }
  0xa8   : > { %798 = vrot.lane.b32.xlu1 %v711_v56, %s1441_s23  ;;  %1323 = vmatpush3.bf16.msra.mxu1 %v1393_v9 }
  0xa9   : > { %1337 = vmatprep.subr.msk.bf16.mxu1 %vm715_vm0, %v1394_v11  ;;  %vm910_vm0 = vcmask 1046528  }
  0xac   : > { %1325 = vmatpush3.bf16.msra.mxu1 %v961_v13 }
 0x10b   : > { %v786_v57 = vpop.permute.xlu1 %785 }
 0x10c   : > { %v803_v62 = vsel %vm800_vm2, %v771_v60, %v786_v57 }
 0x10f   : > { %v788_v58 = vpop.permute.xlu1 %787 }
 0x110   : > { %v806_v2 = vsel %vm800_vm2, %v767_v55, %v788_v58 }
 0x114   : > { %v791_v59 = vpop.permute.xlu0 %790 }
 0x115   : > { %v809_v0 = vsel %vm807_vm3, %v803_v62, %v791_v59 }
 0x116   : > { %v793_v61 = vpop.permute.xlu1 %792 }
 0x117   : > { %v811_v4 = vsel %vm807_vm3, %v806_v2, %v793_v61 }
 0x118   : > { %v797_v1 = vpop.permute.xlu0 %796 }
 0x119   : > { %v814_v3 = vsel %vm812_vm4, %v809_v0, %v797_v1 }
 0x11a   : > { %v799_v5 = vpop.permute.xlu1 %798  ;;  %1318 = vmatprep.mubr.msk.bf16.mxu0 %vm836_vm6, %v814_v3 }
 0x11b   : > { %v816_v7 = vsel %vm812_vm4, %v811_v4, %v799_v5 }
 0x11c   : > { %1319 = vmatmul.mubr.msk.bf16.vlgmr.msra.gmra.mrb[0].mxu0 %vm836_vm6, %v816_v7 }
 0x11d   : > { %1331 = vmatpush3.bf16.msra.mxu0 %v1022_v6  ;;  %1332 = vmatprep.mubr.msk.bf16.mxu0 %vm1442_vm7, %v1439_v46 }
 0x124   : > { %1333 = vmatmul.mubr.msk.bf16.vlgmr.msra.gmra.mrb[4].mxu0 %vm800_vm2, %v1009_v8 }
 0x1ef   : > { %v1320_v12 = vpop.f32.mrb[0].mxu0 }
 0x1f0   : > { %v888_v14 = vadd.f32 %v1320_v12, %v1286_v10  ;;  %v879_v15 = vpop.f32.mrb[1].mxu0 }
 0x1f1   : > { %v880_v16 = vadd.f32 %v1286_v10, %v879_v15  ;;  %v1321_v17 = vpop.f32.mrb[2].mxu0 }
 0x1f2   : > { %v895_v18 = vmax.f32 %v888_v14, 0.0  ;;  %v882_v19 = vpop.f32.mrb[3].mxu0 }
 0x1f3   : > { %v893_v20 = vmax.f32 %v880_v16, 0.0  ;;  %v883_v21 = vadd.f32 %v1286_v10, %v882_v19 }
 0x1f4   : > { %v898_v22 = vsel %vm1589_vm9, %v895_v18, 0.0 }
 0x1f5   : > { %v900_v23 = vpack.c.bf16 %v898_v22, %v898_v22  ;;  %v894_v24 = vmax.f32 %v883_v21, 0.0  ;;  %v896_v26 = vsel %vm1577_vm5, %v893_v20, 0.0  ;;  %vm931_vm5 = vcmask 130048  }
 0x1f7   : > { %v897_v28 = vsel %vm1581_vm8, %v894_v24, 0.0  ;;  %919 = vrot.lane.b32.xlu1 %v900_v23, %s1440_s14  ;;  %v1058_v29 = vpop.f32.mrb[4].mxu0  ;;  %v912_v30 = vrot.slane %v900_v23, 1  ;;  %v904_v32 = vrot.slane %v900_v23, 7  ;;  %vm955_vm8 = vcmask 195584  }
 0x1f8   : > { %v1334_v31 = vpop.f32.mrb[5].mxu0  ;;  %v899_v33 = vpack.c.bf16 %v897_v28, %v896_v26  ;;  %v1059_v54 = vadd.f32 %v1296_v49, %v1058_v29 }
 0x1f9   : > { %v1061_v34 = vpop.f32.mrb[6].mxu0  ;;  %v916_v35 = vsel %vm914_vm10, %v912_v30, 0 }
 0x1fa   : > { %v1335_v36 = vpop.f32.mrb[7].mxu0  ;;  %917 = vrot.lane.b32.xlu0 %v899_v33, %s1440_s14  ;;  %v911_v37 = vrot.slane %v899_v33, 1  ;;  %v903_v38 = vrot.slane %v899_v33, 7 }
 0x1fb   : > { %924 = vrot.lane.b32.xlu1 %v916_v35, %s1443_s22 }
 0x1fc   : > { %v913_v25 = vsel %vm910_vm0, %v911_v37, %v912_v30  ;;  %v905_v27 = vsel %vm769_vm15, %v903_v38, %v904_v32  ;;  %v909_v41 = vsel %vm769_vm15, 0, %v903_v38 }
 0x1fe   : > { %922 = vrot.lane.b32.xlu0 %v913_v25, %s1443_s22 }
 0x269   : > { %v920_v39 = vpop.permute.xlu1 %919 }
 0x26a   : > { %v930_v45 = vsel %vm807_vm3, %v905_v27, %v920_v39 }
 0x26c   : > { %v918_v40 = vpop.permute.xlu0 %917 }
 0x26d   : > { %v925_v42 = vpop.permute.xlu1 %924  ;;  %v927_v43 = vsel %vm807_vm3, %v909_v41, %v918_v40 }
 0x26e   : > { %v935_v47 = vsel %vm931_vm5, %v930_v45, %v925_v42 }
 0x270   : > { %v923_v44 = vpop.permute.xlu0 %922 }
 0x271   : > { %v933_v46 = vsel %vm931_vm5, %v927_v43, %v923_v44 }
 0x272   : > { %1326 = vmatprep.mubr.msk.bf16.mxu1 %vm955_vm8, %v933_v46 }
 0x273   : > { %1327 = vmatmul.mubr.msk.bf16.vlgmr.msra.gmra.mrb[0].mxu1 %vm955_vm8, %v935_v47 }
 0x346   : > { %v1328_v48 = vpop.f32.mrb[0].mxu1 }
 0x347   : > { %v997_v50 = vpop.f32.mrb[1].mxu1 }
 0x348   : > { %v1329_v52 = vpop.f32.mrb[2].mxu1 }
 0x349   : > { %v999_v53 = vpop.f32.mrb[3].mxu1 }
 0x34a   : > { %v1000_v55 = vadd.f32 %v1291_v51, %v999_v53 }
 0x34c   : > { %v1064_v56 = vadd.f32 %v1059_v54, %v1000_v55 }
 0x34e   : > { %1065 = vst.msk [vmem:[%s683_s15] sm:$0xff] %vm807_vm3, %v1064_v56 }
 0x34f PF: > { %s22_s25 = sadd.s32 1, %s1435_s25   ;;  %s1696_s21 = sld [smem:[#allocation2_spill]] }
 0x350   : > { %p19_p10 = scmp.ge.s32.totalorder %s22_s25, 6   ;;  %s1697_s22 = sld [smem:[#allocation3_spill]] }
 0x351   : > { %s1698_s23 = sld [smem:[#allocation4_spill]]  ;;  %s1699_s24 = sld [smem:[#allocation5_spill]] }
 0x352   :  { %21 = sbr.rel (!%p19_p10) target bundleno = 3 (0x3), region = 113 }

</bundles_post_ra>
